<compile_context>
chip_gen: v7x
topology: tpu7x:2x2x1
jax: 0.10.0
libtpu: 0.0.40
codegen_flags: <defaults>
</compile_context>

<pallas_src>
import functools

import jax
import jax.numpy as jnp
from jax.experimental import pallas as pl
from jax.experimental.pallas import tpu as pltpu

TEMPERATURE = 0.7      # temperature_lens
LEAKY_SLOPE = 0.01     # torch.nn.LeakyReLU default
BN_EPS = 1e-5          # torch.nn.BatchNorm1d default


def _round_up(x, m):
    return ((x + m - 1) // m) * m


# -----------------------------------------------------------------------------
# Fused kernel: main explainer + aux explainer + selector as two MXU matmuls
# -----------------------------------------------------------------------------
def _fused_kernel(x_ref, w1_ref, const_ref, wd_ref, slab_ref, *, sel_lane):
    """Refs:
      x_ref    : (B, C)   input concepts
      w1_ref   : (C, W)   fused, alpha_norm-prescaled first-layer weight
                          cols [0,2LH): explainers, [2LH,2LH+C): selector, rest 0
      const_ref: (3, W)   row 0 = first-layer bias, row 1 = per-lane leaky
                          slope, row 2 = second-layer bias (incl. selector)
      wd_ref   : (W, W)   block-diagonal second-layer weight; selector column
                          at lane `sel_lane`; zero-padded elsewhere
      slab_ref : (B, W)   packed [pred | aux | sel | 0-pad] output
    """
    x = x_ref[...]                                                  # (B, C)
    b1 = const_ref[0:1, :]                                          # (1, W)
    slope = const_ref[1:2, :]                                       # (1, W)
    b2 = const_ref[2:3, :]                                          # (1, W)

    # Fused first layer: both explainers (all classes) + selector hidden.
    h = jnp.dot(x, w1_ref[...], preferred_element_type=jnp.float32) + b1   # (B, W)
    # LeakyReLU on explainer lanes, ReLU on selector lanes (slope = 0),
    # no-op on zero pad lanes.
    h = jnp.where(h > 0, h, slope * h)

    # Block-diagonal second layer -> [pred | aux | sel_logit] lane-dense.
    o = jnp.dot(h, wd_ref[...], preferred_element_type=jnp.float32) + b2   # (B, W)

    # Lane-masked sigmoid on the selector lane only; one unmasked full-tile
    # store of the whole slab.  (exp may overflow on unused lanes; jnp.where
    # selects, so no NaN reaches the output.)
    lane = jax.lax.broadcasted_iota(jnp.int32, o.shape, 1)
    sig = 1.0 / (1.0 + jnp.exp(-o))
    slab_ref[...] = jnp.where(lane == sel_lane, sig, o)


# -----------------------------------------------------------------------------
# Wrapper (weight-only math + layout plumbing in plain JAX; one pallas_call)
# -----------------------------------------------------------------------------
def gated_logic_net_forward(concept_x, params, *, temperature=TEMPERATURE):
    concept_x = concept_x.astype(jnp.float32)
    B, C = concept_x.shape
    L, H, _ = params["exp_w1"].shape
    K = 2 * L * H + C                          # fused hidden width
    W = _round_up(max(K, 2 * L + 1), 128)      # lane-dense padded width

    # --- weight-only EntropyLinear math (hoisted out of the kernel) ---------
    w1_3d = jnp.concatenate([params["exp_w1"], params["aux_w1"]], axis=0)   # (2L,H,C)
    gamma = jnp.sum(jnp.abs(w1_3d), axis=1)                                 # (2L,C)
    alpha2 = jax.nn.softmax(gamma / temperature, axis=-1)                   # (2L,C)
    anorm2 = alpha2 / jnp.max(alpha2, axis=-1, keepdims=True)               # (2L,C)
    alpha, alpha_norm = alpha2[:L], anorm2[:L]        # only main explainer returned

    # Pre-scale the first-layer weights by alpha_norm and lay them out (C, W).
    w1s = (w1_3d * anorm2[:, None, :]).reshape(2 * L * H, C)                # (2LH,C)
    sw1t = params["sel_w1"].T                                               # (C,C)
    w1_full = jnp.zeros((C, W), jnp.float32)
    w1_full = w1_full.at[:, :2 * L * H].set(w1s.T)
    w1_full = w1_full.at[:, 2 * L * H:K].set(sw1t)

    # --- fold eval-mode BatchNorm into the selector's second Linear ---------
    bn_scale = params["bn_g"] * jax.lax.rsqrt(params["bn_v"] + BN_EPS)      # (1,C)
    bn_shift = params["bn_b"] - params["bn_m"] * bn_scale                   # (1,C)
    sw2_eff = (params["sel_w2"] * bn_scale).reshape(-1)                     # (C,)
    sb2_eff = jnp.sum(bn_shift * params["sel_w2"]) + params["sel_b2"][0, 0]

    # --- packed (3, W) constant slab: [b1 | per-lane slope | b2] ------------
    b1_full = jnp.zeros((W,), jnp.float32)
    b1_full = b1_full.at[:2 * L * H].set(
        jnp.concatenate([params["exp_b1"].reshape(-1),
                         params["aux_b1"].reshape(-1)]))
    b1_full = b1_full.at[2 * L * H:K].set(params["sel_b1"].reshape(-1))

    slope = jnp.zeros((W,), jnp.float32).at[:2 * L * H].set(LEAKY_SLOPE)

    b2_full = jnp.zeros((W,), jnp.float32)
    b2_full = b2_full.at[:L].set(params["exp_b2"][0, 0])
    b2_full = b2_full.at[L:2 * L].set(params["aux_b2"][0, 0])
    b2_full = b2_full.at[2 * L].set(sb2_eff)

    const = jnp.stack([b1_full, slope, b2_full], axis=0)                    # (3,W)

    # --- block-diagonal second-layer weight + selector column ---------------
    w2_stack = jnp.concatenate([params["exp_w2"], params["aux_w2"]], axis=0)  # (2,H)
    w2_rep = jnp.repeat(w2_stack, L, axis=0)                                  # (2L,H)
    wd_blk = (w2_rep[:, :, None] *
              jnp.eye(2 * L, dtype=jnp.float32)[:, None, :]).reshape(2 * L * H, 2 * L)
    wd = jnp.zeros((W, W), jnp.float32)
    wd = wd.at[:2 * L * H, :2 * L].set(wd_blk)
    wd = wd.at[2 * L * H:K, 2 * L].set(sw2_eff)

    vmem = pl.BlockSpec(memory_space=pltpu.MemorySpace.VMEM)

    slab = pl.pallas_call(
        functools.partial(_fused_kernel, sel_lane=2 * L),
        out_shape=jax.ShapeDtypeStruct((B, W), jnp.float32),
        in_specs=[vmem,    # concept_x        (B, C)
                  vmem,    # fused W1         (C, W)
                  vmem,    # const slab       (3, W)
                  vmem],   # block-diag W2    (W, W)
        out_specs=vmem,
    )(concept_x, w1_full, const, wd)

    prediction_out = slab[:, :L]
    auxiliary_out = slab[:, L:2 * L]
    selection_out = slab[:, 2 * L:2 * L + 1]

    concept_mask = alpha_norm > 0.5
    # TODO(synk): torch Conceptizator is assumed to be identity with threshold
    # 0.5 (as configured); if it applied e.g. a sigmoid, this output would differ.
    conceptizator_concepts = concept_x[None, :, :]           # (1, B, C)

    return (prediction_out, selection_out, auxiliary_out,
            concept_mask, alpha, alpha_norm, conceptizator_concepts)


# -----------------------------------------------------------------------------
# Pure-JAX reference (for correctness check)
# -----------------------------------------------------------------------------
def _reference(concept_x, params, temperature=TEMPERATURE):
    def explainer(w1, b1, w2, b2):
        gamma = jnp.sum(jnp.abs(w1), axis=1)
        alpha = jax.nn.softmax(gamma / temperature, axis=1)
        alpha_norm = alpha / jnp.max(alpha, axis=1, keepdims=True)
        xw = concept_x[None] * alpha_norm[:, None, :]
        h = jnp.einsum('lbc,lhc->lbh', xw, w1) + b1[:, None, :]
        h = jnp.where(h > 0, h, LEAKY_SLOPE * h)
        out = jnp.einsum('lbh,oh->lbo', h, w2) + b2[0, 0]
        return out[:, :, 0].T, alpha, alpha_norm

    pred, alpha, alpha_norm = explainer(params["exp_w1"], params["exp_b1"],
                                        params["exp_w2"], params["exp_b2"])
    aux, _, _ = explainer(params["aux_w1"], params["aux_b1"],
                          params["aux_w2"], params["aux_b2"])
    h = concept_x @ params["sel_w1"].T + params["sel_b1"]
    h = jnp.maximum(h, 0.0)
    h = (h - params["bn_m"]) / jnp.sqrt(params["bn_v"] + BN_EPS) \
        * params["bn_g"] + params["bn_b"]
    sel = jax.nn.sigmoid(h @ params["sel_w2"].T + params["sel_b2"])
    return pred, sel, aux, alpha, alpha_norm


# -----------------------------------------------------------------------------
# Main
# -----------------------------------------------------------------------------
if __name__ == "__main__":
    B, C, L, H = 8, 16, 4, 10   # batch, n_concepts, n_classes, hidden_nodes[0]

    key = jax.random.PRNGKey(0)
    ks = jax.random.split(key, 11)

    params = {
        # main explainer: EntropyLinear(C -> H per class) + Linear(H -> 1)
        "exp_w1": 0.1 * jax.random.normal(ks[0], (L, H, C), jnp.float32),
        "exp_b1": 0.1 * jax.random.normal(ks[1], (L, H), jnp.float32),
        "exp_w2": 0.1 * jax.random.normal(ks[2], (1, H), jnp.float32),
        "exp_b2": 0.1 * jax.random.normal(ks[3], (1, 1), jnp.float32),
        # auxiliary explainer
        "aux_w1": 0.1 * jax.random.normal(ks[4], (L, H, C), jnp.float32),
        "aux_b1": 0.1 * jax.random.normal(ks[5], (L, H), jnp.float32),
        "aux_w2": 0.1 * jax.random.normal(ks[6], (1, H), jnp.float32),
        "aux_b2": 0.1 * jax.random.normal(ks[7], (1, 1), jnp.float32),
        # selector (torch init: Linear weight ~ N(0, 0.01), bias = 0; BN gamma=1)
        "sel_w1": 0.01 * jax.random.normal(ks[8], (C, C), jnp.float32),
        "sel_b1": jnp.zeros((1, C), jnp.float32),
        "sel_w2": 0.01 * jax.random.normal(ks[9], (1, C), jnp.float32),
        "sel_b2": jnp.zeros((1, 1), jnp.float32),
        "bn_g": jnp.ones((1, C), jnp.float32),
        "bn_b": jnp.zeros((1, C), jnp.float32),
        "bn_m": jnp.zeros((1, C), jnp.float32),   # eval-mode running stats
        "bn_v": jnp.ones((1, C), jnp.float32),
    }

    concept_x = jax.random.uniform(ks[10], (B, C), jnp.float32)

    outs = jax.jit(gated_logic_net_forward)(concept_x, params)
    outs = jax.block_until_ready(outs)
    (pred, sel, aux, mask, alpha, alpha_norm, concepts) = outs

    # sanity: shapes
    assert pred.shape == (B, L)
    assert sel.shape == (B, 1)
    assert aux.shape == (B, L)
    assert mask.shape == (L, C) and mask.dtype == jnp.bool_
    assert alpha.shape == (L, C) and alpha_norm.shape == (L, C)
    assert concepts.shape == (1, B, C)

    # sanity: numerics vs plain-JAX reference
    r_pred, r_sel, r_aux, r_alpha, r_anorm = _reference(concept_x, params)
    assert jnp.allclose(pred, r_pred, atol=1e-5, rtol=1e-5)
    assert jnp.allclose(sel, r_sel, atol=1e-5, rtol=1e-5)
    assert jnp.allclose(aux, r_aux, atol=1e-5, rtol=1e-5)
    assert jnp.allclose(alpha, r_alpha, atol=1e-6, rtol=1e-5)
    assert jnp.allclose(alpha_norm, r_anorm, atol=1e-6, rtol=1e-5)

    print("KERNEL_OK")
</pallas_src>

<mosaic_0001>
module attributes {stable_mosaic.version = 11 : i64} {
  func.func @_fused_kernel(%arg0: memref<8x16xf32, #tpu.memory_space<vmem>>, %arg1: memref<16x128xf32, #tpu.memory_space<vmem>>, %arg2: memref<3x128xf32, #tpu.memory_space<vmem>>, %arg3: memref<128x128xf32, #tpu.memory_space<vmem>>, %arg4: memref<8x128xf32, #tpu.memory_space<vmem>>) attributes {dimension_semantics = [], scalar_prefetch = 0 : i64, scratch_operands = 0 : i64, tpu.core_type = #tpu.core_type<tc>} {
    %c0 = arith.constant 0 : index
    %c0_0 = arith.constant 0 : index
    %0 = vector.load %arg0[%c0, %c0_0] : memref<8x16xf32, #tpu.memory_space<vmem>>, vector<8x16xf32>
    %c0_1 = arith.constant 0 : index
    %c0_2 = arith.constant 0 : index
    %1 = vector.load %arg2[%c0_1, %c0_2] : memref<3x128xf32, #tpu.memory_space<vmem>>, vector<1x128xf32>
    %c1 = arith.constant 1 : index
    %c0_3 = arith.constant 0 : index
    %2 = vector.load %arg2[%c1, %c0_3] : memref<3x128xf32, #tpu.memory_space<vmem>>, vector<1x128xf32>
    %c2 = arith.constant 2 : index
    %c0_4 = arith.constant 0 : index
    %3 = vector.load %arg2[%c2, %c0_4] : memref<3x128xf32, #tpu.memory_space<vmem>>, vector<1x128xf32>
    %c0_5 = arith.constant 0 : index
    %c0_6 = arith.constant 0 : index
    %4 = vector.load %arg1[%c0_5, %c0_6] : memref<16x128xf32, #tpu.memory_space<vmem>>, vector<16x128xf32>
    %cst = arith.constant dense<0.000000e+00> : vector<8x128xf32>
    %5 = tpu.matmul %0, %4, %cst {dimension_numbers = #tpu.dot_dimension_numbers<[1], [0], [0], [1], [0, 0, 1, 1], [], []>} : vector<8x16xf32>, vector<16x128xf32>, vector<8x128xf32> -> vector<8x128xf32>
    %6 = vector.broadcast %1 : vector<1x128xf32> to vector<8x128xf32>
    %7 = arith.addf %5, %6 : vector<8x128xf32>
    %cst_7 = arith.constant 0.000000e+00 : f32
    %8 = vector.broadcast %cst_7 : f32 to vector<8x128xf32>
    %9 = arith.cmpf ogt, %7, %8 : vector<8x128xf32>
    %10 = vector.broadcast %2 : vector<1x128xf32> to vector<8x128xf32>
    %11 = arith.mulf %10, %7 : vector<8x128xf32>
    %12 = arith.select %9, %7, %11 : vector<8x128xi1>, vector<8x128xf32>
    %c0_8 = arith.constant 0 : index
    %c0_9 = arith.constant 0 : index
    %13 = vector.load %arg3[%c0_8, %c0_9] : memref<128x128xf32, #tpu.memory_space<vmem>>, vector<128x128xf32>
    %cst_10 = arith.constant dense<0.000000e+00> : vector<8x128xf32>
    %14 = tpu.matmul %12, %13, %cst_10 {dimension_numbers = #tpu.dot_dimension_numbers<[1], [0], [0], [1], [0, 0, 1, 1], [], []>} : vector<8x128xf32>, vector<128x128xf32>, vector<8x128xf32> -> vector<8x128xf32>
    %15 = vector.broadcast %3 : vector<1x128xf32> to vector<8x128xf32>
    %16 = arith.addf %14, %15 : vector<8x128xf32>
    %17 = tpu.iota {dimensions = array<i32: 1>} : vector<8x128xi32>
    %cst_11 = arith.constant 0.000000e+00 : f32
    %18 = vector.broadcast %cst_11 : f32 to vector<8x128xf32>
    %19 = arith.subf %18, %16 : vector<8x128xf32>
    %20 = math.exp %19 : vector<8x128xf32>
    %cst_12 = arith.constant 1.000000e+00 : f32
    %21 = vector.broadcast %cst_12 : f32 to vector<8x128xf32>
    %22 = arith.addf %21, %20 : vector<8x128xf32>
    %cst_13 = arith.constant 1.000000e+00 : f32
    %23 = vector.broadcast %cst_13 : f32 to vector<8x128xf32>
    %24 = arith.divf %23, %22 : vector<8x128xf32>
    %c8_i32 = arith.constant 8 : i32
    %25 = vector.broadcast %c8_i32 : i32 to vector<8x128xi32>
    %26 = arith.cmpi eq, %17, %25 : vector<8x128xi32>
    %27 = arith.select %26, %24, %16 : vector<8x128xi1>, vector<8x128xf32>
    %c0_14 = arith.constant 0 : index
    %c0_15 = arith.constant 0 : index
    %28 = vector.load %arg4[%c0_14, %c0_15] : memref<8x128xf32, #tpu.memory_space<vmem>>, vector<8x128xf32>
    tpu.vector_store %arg4[%c0_14, %c0_15], %27 {strides = array<i32>} : memref<8x128xf32, #tpu.memory_space<vmem>>, vector<8x128xf32>,
    return
  }
}

</mosaic_0001>

<bundles_post_ra>
// kernel: gated_logic_net_forward.1
= control target key start
LH: loop header
LB: loop body
LE: loop exit
PB: predicated region body
PF: predicated region fallthrough
CT: control target
= control target key end

     0   :  { %v313_v0 = vmov 0.0|0.0   ;;  %vm314_vm0 = vmmov 0   ;;  %v315_v3 = vmov 0.0   ;;  %vm27_vm1 = vcmask 130048   ;;  %s410_s1 = inlined_call_operand.vmem [shape: f32[16,128], index: 1, kind: input, shape index: {}]   ;;  %s411_s3 = inlined_call_operand.vmem [shape: f32[128,128], index: 3, kind: input, shape index: {}]   ;;  %s412_s0 = inlined_call_operand.vmem [shape: f32[8,16], index: 0, kind: input, shape index: {}]   ;;  %s413_s2 = inlined_call_operand.vmem [shape: f32[3,128], index: 2, kind: input, shape index: {}]   ;;  %s414_s4 = inlined_call_operand.vmem [shape: f32[8,128], index: 4, kind: output, shape index: {}]  }
   0x1   :  { %279 = vmatprep.subr.bf16.mxu0 %v313_v0  ;;  %v21_v1 = vld [vmem:[%s410_s1] sm:$0xff]  ;;  %v22_v2 = vld [vmem:[%s410_s1 + $0x8] sm:$0xff]  ;;  %241 = vmatprep.mubr.msk.f32.mxu0 %vm314_vm0, %v315_v3  ;;  %v110_v7 = vld [vmem:[%s411_s3 + $0x10] sm:$0xff]  ;;  %v198_v45 = vlaneseq }
   0x2   :  { %v280_v4 = vpack.c.bf16 %v22_v2, %v21_v1  ;;  %282 = vmatprep.subr.bf16.mxu1 %v313_v0  ;;  %v108_v5 = vld [vmem:[%s411_s3] sm:$0xff]  ;;  %v109_v6 = vld [vmem:[%s411_s3 + $0x8] sm:$0xff]  ;;  %276 = vmatprep.mubr.msk.f32.mxu1 %vm314_vm0, %v315_v3  ;;  %v111_v9 = vld [vmem:[%s411_s3 + $0x18] sm:$0xff] }
   0x3   :  { %v283_v8 = vpack.c.bf16 %v109_v6, %v108_v5  ;;  %v17_v10 = vld [vmem:[%s412_s0] sm:$0xff]  ;;  %v286_v11 = vpack.c.bf16 %v111_v9, %v110_v7  ;;  %v113_v13 = vld [vmem:[%s411_s3 + $0x28] sm:$0xff]  ;;  %v114_v15 = vld [vmem:[%s411_s3 + $0x30] sm:$0xff]  ;;  %v199_v46 = vand.u32 127, %v198_v45 }
   0x4   :  { %281 = vmatpush3.bf16.msra.mxu0 %v280_v4  ;;  %v112_v12 = vld [vmem:[%s411_s3 + $0x20] sm:$0xff]  ;;  %v115_v16 = vld [vmem:[%s411_s3 + $0x38] sm:$0xff]  ;;  %v117_v19 = vld [vmem:[%s411_s3 + $0x48] sm:$0xff] }
   0x5   :  { %284 = vmatpush3.bf16.msra.mxu1 %v283_v8  ;;  %v289_v14 = vpack.c.bf16 %v113_v13, %v112_v12  ;;  %v292_v17 = vpack.c.bf16 %v115_v16, %v114_v15  ;;  %v116_v18 = vld [vmem:[%s411_s3 + $0x40] sm:$0xff]  ;;  %v118_v21 = vld [vmem:[%s411_s3 + $0x50] sm:$0xff]  ;;  %v119_v22 = vld [vmem:[%s411_s3 + $0x58] sm:$0xff]  ;;  %vm206_vm3 = vcmp.eq.s32.totalorder %v199_v46, 8 }
   0x6   :  { %285 = vmatprep.subr.bf16.mxu1 %v313_v0  ;;  %v295_v20 = vpack.c.bf16 %v117_v19, %v116_v18  ;;  %v298_v23 = vpack.c.bf16 %v119_v22, %v118_v21  ;;  %v120_v24 = vld [vmem:[%s411_s3 + $0x60] sm:$0xff]  ;;  %v121_v25 = vld [vmem:[%s411_s3 + $0x68] sm:$0xff]  ;;  %v122_v27 = vld [vmem:[%s411_s3 + $0x70] sm:$0xff] }
   0x7   :  { %242 = vmatmul.mubr.msk.f32.vlgmr.msra.gmra.mrb[0].mxu0 %vm27_vm1, %v17_v10  ;;  %v301_v26 = vpack.c.bf16 %v121_v25, %v120_v24  ;;  %v123_v28 = vld [vmem:[%s411_s3 + $0x78] sm:$0xff]  ;;  %v213_v30 = vld [vmem:[%s413_s2] ss:$0 sm:$0xff]  ;;  %v215_v31 = vld [vmem:[%s413_s2 + $0x1] ss:$0 sm:$0xff] }
   0x8   :  { %v304_v29 = vpack.c.bf16 %v123_v28, %v122_v27  ;;  %v216_v37 = vld [vmem:[%s413_s2 + $0x2] ss:$0 sm:$0xff] }
   0x9   :  { %287 = vmatpush3.bf16.msra.mxu1 %v286_v11 }
   0xa   :  { %288 = vmatprep.subr.bf16.mxu1 %v313_v0 }
   0xd   :  { %290 = vmatpush3.bf16.msra.mxu1 %v289_v14 }
   0xe   :  { %291 = vmatprep.subr.bf16.mxu1 %v313_v0 }
  0x11   :  { %293 = vmatpush3.bf16.msra.mxu1 %v292_v17 }
  0x12   :  { %294 = vmatprep.subr.bf16.mxu1 %v313_v0 }
  0x15   :  { %296 = vmatpush3.bf16.msra.mxu1 %v295_v20 }
  0x16   :  { %297 = vmatprep.subr.bf16.mxu1 %v313_v0 }
  0x19   :  { %299 = vmatpush3.bf16.msra.mxu1 %v298_v23 }
  0x1a   :  { %300 = vmatprep.subr.bf16.mxu1 %v313_v0 }
  0x1d   :  { %302 = vmatpush3.bf16.msra.mxu1 %v301_v26 }
  0x1e   :  { %303 = vmatprep.subr.bf16.mxu1 %v313_v0 }
  0x21   :  { %305 = vmatpush3.bf16.msra.mxu1 %v304_v29 }
  0xda   :  { %v97_v32 = vpop.f32.mrb[0].mxu0 }
  0xdb   :  { %v98_v33 = vadd.f32 %v213_v30, %v97_v32  ;;  %v243_v34 = vpop.f32.mrb[1].mxu0 }
  0xdd   :  { %v106_v35 = vmul.f32 %v215_v31, %v98_v33  ;;  %vm101_vm2 = vcmp.gt.f32.partialorder %v98_v33, 0.0 }
  0xdf   :  { %v107_v36 = vsel %vm101_vm2, %v98_v33, %v106_v35 }
  0xe0   :  { %277 = vmatmul.mubr.f32.vlgmr.msra.gmra.mrb[0].mxu1 %v107_v36 }
 0x1b3   :  { %v194_v38 = vpop.f32.mrb[0].mxu1 }
 0x1b4   :  { %v195_v39 = vadd.f32 %v216_v37, %v194_v38  ;;  %v278_v40 = vpop.f32.mrb[1].mxu1 }
 0x1b6   :  { %v200_v41 = vsub.f32 0.0, %v195_v39 }
 0x1b8   :  { %v201_v42 = vmul.f32 1.442695, %v200_v41 }
 0x1ba   :  { %309 = vpow2.f32 %v201_v42 }
 0x1c4   :  { %v310_v43 = vpop.eup %309 }
 0x1c5   :  { %v203_v44 = vadd.f32 1.0, %v310_v43 }
 0x1c7   :  { %311 = vrcp.f32 %v203_v44 }
 0x1d1   :  { %v312_v47 = vpop.eup %311 }
 0x1d2   :  { %v207_v48 = vsel %vm206_vm3, %v312_v47, %v195_v39 }
 0x1d3   :  { %208 = vst [vmem:[%s414_s4] sm:$0xff] %v207_v48 }

</bundles_post_ra>
